<compile_context>
chip_gen: v6e
topology: v6e:2x2x1
jax: 0.10.0
libtpu: 0.0.40
codegen_flags: <defaults>
</compile_context>

<pallas_src>
import functools

import jax
import jax.numpy as jnp
import numpy as np
from jax.experimental import pallas as pl
from jax.experimental.pallas import tpu as pltpu


def _round_up(x, m):
    return (x + m - 1) // m * m


# ----------------------------------------------------------------------------
# Kernel: one tile of `tm` batch rows, 5 MXU stages total.
#   ab   = x @ W_front + b_front          (embed+fc1+scale+Q/K replication)
#   s    = (a*bm) @ R_S                   (all-pairs head scores, packed)
#   attn = p * 1/(p @ R_DD)               (softmax over key-head within group)
#   wx   = attn @ R_W                     (broadcast weights to packed layout)
#   y    = (wx*bm) @ W_back + b_back      (attn@V + fc2 + pred, fused)
# ----------------------------------------------------------------------------
def _feat_attn_kernel(x_ref, wf_ref, bf_ref, rs_ref, rdd_ref, rw_ref,
                      wback_ref, bback_ref, o_ref, *, nhE):
    f32 = jnp.float32

    # fused embed + per-head fc1 + 1/sqrt(hd)**0.5 scale + Q/K replication
    ab = jnp.dot(x_ref[...], wf_ref[...], preferred_element_type=f32) + bf_ref[...]
    a = ab[:, :nhE]            # query-head replicated layout  (tm, nhE)
    bm = ab[:, nhE:]           # key-head   replicated layout  (tm, nhE)

    # packed scores: s[:, i*nh+j] = <head_i, head_j> / sqrt(hd)
    s = jnp.dot(a * bm, rs_ref[...], preferred_element_type=f32)   # (tm, nh*nh)

    # softmax over key-head j within each query-head group i.
    # Global row max is a valid shift (constant in j for every i); eps guards
    # the (far off-regime) case where a cold group's denominator underflows.
    m = jnp.max(s, axis=-1, keepdims=True)
    p = jnp.exp(s - m)                                             # (tm, nh*nh)
    den = jnp.dot(p, rdd_ref[...], preferred_element_type=f32)     # in-group sum,
    attn = p * pl.reciprocal(den + 1e-30, approx=True)             #  pre-broadcast

    # attn @ V (V == scaled heads, the hd**0.25 compensation lives in W_back),
    # then fused per-head fc2 + pred — all in one matmul.
    wx = jnp.dot(attn, rw_ref[...], preferred_element_type=f32)    # (tm, nhE)
    y = jnp.dot(wx * bm, wback_ref[...], preferred_element_type=f32) + bback_ref[...]
    o_ref[...] = y.astype(o_ref.dtype)


# ----------------------------------------------------------------------------
# Wrapper
# ----------------------------------------------------------------------------
def feat_attn_3h(x, params, *, n_head, tm=1024):
    """params = (We, be, W1, b1, W2, b2, Wp, bp) with PyTorch (out, in) weights.

    tm is the batch tile (main tuning knob; sweep 256-2048 for large batches).
    The tile is capped so the grid always has >= 2 steps (v7x dual TensorCore).
    """
    We, be, W1, b1, W2, b2, Wp, bp = params
    B, input_dim = x.shape
    n_embd = We.shape[0]
    output_dim = Wp.shape[0]
    head_dim = n_embd // n_head
    E, nh = n_embd, n_head
    nhE, nh2 = nh * E, nh * nh
    f32 = jnp.float32
    s_q = float(head_dim) ** -0.25     # split 1/sqrt(hd) evenly onto Q and K

    # ---- host-side algebraic fusion of the four Linear layers ----
    BD1 = jnp.kron(jnp.eye(nh, dtype=f32), W1.T)      # blockdiag(W1^T)
    BD2 = jnp.kron(jnp.eye(nh, dtype=f32), W2.T)      # blockdiag(W2^T)
    Wa = We.T @ BD1                                   # (D_in, E)  embed+fc1
    ba = be @ BD1 + jnp.tile(b1, nh)                  # (E,)
    Wb = (BD2 @ Wp.T) * (float(head_dim) ** 0.25)     # fc2+pred (+V-scale comp)
    bb = (jnp.tile(b2, nh) @ Wp.T + bp).reshape(1, output_dim)

    # ---- constant 0/1 replication / segment matrices (host, tiny) ----
    c = np.arange(nhE)
    i_idx = c // E                       # query-head index of packed column c
    j_idx = (c % E) // head_dim          # key-head index
    d_idx = c % head_dim                 # within-head dim
    R_A = np.zeros((E, nhE), np.float32); R_A[i_idx * head_dim + d_idx, c] = 1.0
    R_B = np.zeros((E, nhE), np.float32); R_B[j_idx * head_dim + d_idx, c] = 1.0
    R_S = np.zeros((nhE, nh2), np.float32); R_S[c, i_idx * nh + j_idx] = 1.0
    g = np.arange(nh2)
    R_D = np.zeros((nh2, nh), np.float32); R_D[g, g // nh] = 1.0
    R_DD = R_D @ R_D.T                   # (nh2, nh2): in-group sum + broadcast
    R_W = np.ascontiguousarray(R_S.T)    # (nh2, nhE): expand attn to packed
    R_O = np.ascontiguousarray(R_A.T)    # (nhE, E):  segment-sum over j

    # ---- front fold: ONE (D_in, 2*nhE) matmul replaces 3 MXU stages ----
    R_AB = jnp.asarray(np.concatenate([R_A, R_B], axis=1))     # (E, 2*nhE)
    W_front = s_q * (Wa @ R_AB)                                # (D_in, 2*nhE)
    b_front = (s_q * (ba @ R_AB)).reshape(1, 2 * nhE)

    # ---- back fold: segment-sum + fc2 + pred in ONE (nhE, out) matmul ----
    W_back = jnp.asarray(R_O) @ Wb                             # (nhE, out)
    b_back = bb

    # ---- batch tiling: no host pad, partial last block handled by Pallas;
    #      keep >= 2 grid steps so both v7x TensorCores get work ----
    tm_eff = max(8, min(tm, _round_up(pl.cdiv(B, 2), 8)))
    grid = (pl.cdiv(B, tm_eff),)

    def full_spec(shape):
        return pl.BlockSpec(shape, lambda i: (0,) * len(shape))

    kernel = functools.partial(_feat_attn_kernel, nhE=nhE)

    # TODO(synk): at large E (>=512) the packed replication matmuls stop being
    # free (O(nh*E^2) FLOPs/row) and their double-buffered VMEM grows as nh*E^2;
    # switch the constant-weight specs to pipeline_mode=pl.Buffered(1) or drop
    # the replication trick for per-head ops in that regime.
    out = pl.pallas_call(
        kernel,
        out_shape=jax.ShapeDtypeStruct((B, output_dim), x.dtype),
        grid_spec=pltpu.PrefetchScalarGridSpec(
            num_scalar_prefetch=0,
            grid=grid,
            in_specs=[
                pl.BlockSpec((tm_eff, input_dim), lambda i: (i, 0)),  # x tile
                full_spec((input_dim, 2 * nhE)),   # W_front
                full_spec((1, 2 * nhE)),           # b_front
                full_spec((nhE, nh2)),             # R_S
                full_spec((nh2, nh2)),             # R_DD
                full_spec((nh2, nhE)),             # R_W
                full_spec((nhE, output_dim)),      # W_back
                full_spec((1, output_dim)),        # b_back
            ],
            out_specs=pl.BlockSpec((tm_eff, output_dim), lambda i: (i, 0)),
        ),
        compiler_params=pltpu.CompilerParams(
            dimension_semantics=("parallel",)),
    )(x, W_front, b_front, jnp.asarray(R_S), jnp.asarray(R_DD),
      jnp.asarray(R_W), W_back, b_back)

    return out


# ----------------------------------------------------------------------------
# Pure-JAX reference (mirrors the PyTorch forward exactly)
# ----------------------------------------------------------------------------
def ref_forward(x, params, n_head):
    We, be, W1, b1, W2, b2, Wp, bp = params
    n_embd = We.shape[0]
    head_dim = n_embd // n_head
    e = x @ We.T + be                                   # embed
    e = e.reshape(x.shape[0], n_head, head_dim)         # B (nh hs) -> B nh hs
    h1 = e @ W1.T + b1                                  # fc1
    s = jnp.einsum('bid,bjd->bij', h1, h1) / jnp.sqrt(jnp.float32(head_dim))
    a = jax.nn.softmax(s, axis=-1)
    o = jnp.einsum('bij,bjd->bid', a, h1)               # SDPA(x, x, x)
    h2 = o @ W2.T + b2                                  # fc2
    h2 = h2.reshape(x.shape[0], n_embd)                 # B nh hs -> B (nh hs)
    return h2 @ Wp.T + bp                               # pred


if __name__ == "__main__":
    B, input_dim, n_embd, n_head, output_dim = 16, 32, 32, 4, 16
    head_dim = n_embd // n_head

    key = jax.random.PRNGKey(0)
    ks = jax.random.split(key, 10)
    x = jax.random.normal(ks[0], (B, input_dim), dtype=jnp.float32)

    # deterministic synthetic parameters (PyTorch Linear convention: W (out,in))
    params = (
        jax.random.normal(ks[1], (n_embd, input_dim), jnp.float32) * 0.1,   # We
        jax.random.normal(ks[2], (n_embd,), jnp.float32) * 0.1,             # be
        jax.random.normal(ks[3], (head_dim, head_dim), jnp.float32) * 0.1,  # W1
        jax.random.normal(ks[4], (head_dim,), jnp.float32) * 0.1,           # b1
        jax.random.normal(ks[5], (head_dim, head_dim), jnp.float32) * 0.1,  # W2
        jax.random.normal(ks[6], (head_dim,), jnp.float32) * 0.1,           # b2
        jax.random.normal(ks[7], (output_dim, n_embd), jnp.float32) * 0.1,  # Wp
        jax.random.normal(ks[8], (output_dim,), jnp.float32) * 0.1,         # bp
    )

    # base case
    out = jax.block_until_ready(feat_attn_3h(x, params, n_head=n_head, tm=1024))
    ref = ref_forward(x, params, n_head)
    assert out.shape == (B, output_dim)
    assert jnp.allclose(out, ref, rtol=1e-3, atol=1e-3), (
        float(jnp.max(jnp.abs(out - ref))))

    # ragged batch (B not a multiple of the tile) — partial last block, no pad
    xr = x[:13]
    out_r = jax.block_until_ready(feat_attn_3h(xr, params, n_head=n_head, tm=1024))
    ref_r = ref_forward(xr, params, n_head)
    assert out_r.shape == (13, output_dim)
    assert jnp.allclose(out_r, ref_r, rtol=1e-3, atol=1e-3), (
        float(jnp.max(jnp.abs(out_r - ref_r))))

    # larger batch exercising the >=2-step tile cap with a bigger tile
    xb = jax.random.normal(ks[9], (300, input_dim), dtype=jnp.float32)
    out_b = jax.block_until_ready(feat_attn_3h(xb, params, n_head=n_head, tm=1024))
    ref_b = ref_forward(xb, params, n_head)
    assert out_b.shape == (300, output_dim)
    assert jnp.allclose(out_b, ref_b, rtol=1e-3, atol=1e-3), (
        float(jnp.max(jnp.abs(out_b - ref_b))))

    print("KERNEL_OK")
</pallas_src>

<mosaic_0001>
module attributes {stable_mosaic.version = 11 : i64} {
  func.func @_feat_attn_kernel(%arg0: i32, %arg1: memref<8x32xf32, #tpu.memory_space<vmem>>, %arg2: memref<32x256xf32, #tpu.memory_space<vmem>>, %arg3: memref<1x256xf32, #tpu.memory_space<vmem>>, %arg4: memref<128x16xf32, #tpu.memory_space<vmem>>, %arg5: memref<16x16xf32, #tpu.memory_space<vmem>>, %arg6: memref<16x128xf32, #tpu.memory_space<vmem>>, %arg7: memref<128x16xf32, #tpu.memory_space<vmem>>, %arg8: memref<1x16xf32, #tpu.memory_space<vmem>>, %arg9: memref<8x16xf32, #tpu.memory_space<vmem>>) attributes {dimension_semantics = [#tpu.dimension_semantics<parallel>], iteration_bounds = array<i64: 2>, scalar_prefetch = 0 : i64, scratch_operands = 0 : i64, tpu.core_type = #tpu.core_type<tc>, window_params = [{transform_indices = @transform_0, window_bounds = array<i64: 8, 32>}, {pipeline_mode = #tpu.pipeline_mode<synchronous>, transform_indices = @transform_1, window_bounds = array<i64: 32, 256>}, {pipeline_mode = #tpu.pipeline_mode<synchronous>, transform_indices = @transform_2, window_bounds = array<i64: 1, 256>}, {pipeline_mode = #tpu.pipeline_mode<synchronous>, transform_indices = @transform_3, window_bounds = array<i64: 128, 16>}, {pipeline_mode = #tpu.pipeline_mode<synchronous>, transform_indices = @transform_4, window_bounds = array<i64: 16, 16>}, {pipeline_mode = #tpu.pipeline_mode<synchronous>, transform_indices = @transform_5, window_bounds = array<i64: 16, 128>}, {pipeline_mode = #tpu.pipeline_mode<synchronous>, transform_indices = @transform_6, window_bounds = array<i64: 128, 16>}, {pipeline_mode = #tpu.pipeline_mode<synchronous>, transform_indices = @transform_7, window_bounds = array<i64: 1, 16>}, {transform_indices = @transform_8, window_bounds = array<i64: 8, 16>}]} {
    %c0 = arith.constant 0 : index
    %c0_0 = arith.constant 0 : index
    %0 = vector.load %arg1[%c0, %c0_0] : memref<8x32xf32, #tpu.memory_space<vmem>>, vector<8x32xf32>
    %c0_1 = arith.constant 0 : index
    %c0_2 = arith.constant 0 : index
    %1 = vector.load %arg2[%c0_1, %c0_2] : memref<32x256xf32, #tpu.memory_space<vmem>>, vector<32x256xf32>
    %cst = arith.constant dense<0.000000e+00> : vector<8x256xf32>
    %2 = tpu.matmul %0, %1, %cst {dimension_numbers = #tpu.dot_dimension_numbers<[1], [0], [0], [1], [0, 0, 1, 1], [], []>} : vector<8x32xf32>, vector<32x256xf32>, vector<8x256xf32> -> vector<8x256xf32>
    %c0_3 = arith.constant 0 : index
    %c0_4 = arith.constant 0 : index
    %3 = vector.load %arg3[%c0_3, %c0_4] : memref<1x256xf32, #tpu.memory_space<vmem>>, vector<1x256xf32>
    %4 = vector.broadcast %3 : vector<1x256xf32> to vector<8x256xf32>
    %5 = arith.addf %2, %4 : vector<8x256xf32>
    %6 = vector.extract_strided_slice %5 {offsets = [0, 0], sizes = [8, 128], strides = [1, 1]} : vector<8x256xf32> to vector<8x128xf32>
    %7 = vector.extract_strided_slice %5 {offsets = [0, 128], sizes = [8, 128], strides = [1, 1]} : vector<8x256xf32> to vector<8x128xf32>
    %8 = arith.mulf %6, %7 : vector<8x128xf32>
    %c0_5 = arith.constant 0 : index
    %c0_6 = arith.constant 0 : index
    %9 = vector.load %arg4[%c0_5, %c0_6] : memref<128x16xf32, #tpu.memory_space<vmem>>, vector<128x16xf32>
    %cst_7 = arith.constant dense<0.000000e+00> : vector<8x16xf32>
    %10 = tpu.matmul %8, %9, %cst_7 {dimension_numbers = #tpu.dot_dimension_numbers<[1], [0], [0], [1], [0, 0, 1, 1], [], []>} : vector<8x128xf32>, vector<128x16xf32>, vector<8x16xf32> -> vector<8x16xf32>
    %cst_8 = arith.constant dense<0xFF800000> : vector<8xf32>
    %11 = vector.multi_reduction <maximumf>, %10, %cst_8 [1] : vector<8x16xf32> to vector<8xf32>
    %12 = vector.shape_cast %11 : vector<8xf32> to vector<8x1xf32>
    %13 = vector.broadcast %12 : vector<8x1xf32> to vector<8x16xf32>
    %14 = arith.subf %10, %13 : vector<8x16xf32>
    %15 = math.exp %14 : vector<8x16xf32>
    %c0_9 = arith.constant 0 : index
    %c0_10 = arith.constant 0 : index
    %16 = vector.load %arg5[%c0_9, %c0_10] : memref<16x16xf32, #tpu.memory_space<vmem>>, vector<16x16xf32>
    %cst_11 = arith.constant dense<0.000000e+00> : vector<8x16xf32>
    %17 = tpu.matmul %15, %16, %cst_11 {dimension_numbers = #tpu.dot_dimension_numbers<[1], [0], [0], [1], [0, 0, 1, 1], [], []>} : vector<8x16xf32>, vector<16x16xf32>, vector<8x16xf32> -> vector<8x16xf32>
    %cst_12 = arith.constant 1.000000e-30 : f32
    %18 = vector.broadcast %cst_12 : f32 to vector<8x16xf32>
    %19 = arith.addf %17, %18 : vector<8x16xf32>
    %20 = tpu.reciprocal %19 {approx = true} : vector<8x16xf32> -> vector<8x16xf32>
    %21 = arith.mulf %15, %20 : vector<8x16xf32>
    %c0_13 = arith.constant 0 : index
    %c0_14 = arith.constant 0 : index
    %22 = vector.load %arg6[%c0_13, %c0_14] : memref<16x128xf32, #tpu.memory_space<vmem>>, vector<16x128xf32>
    %cst_15 = arith.constant dense<0.000000e+00> : vector<8x128xf32>
    %23 = tpu.matmul %21, %22, %cst_15 {dimension_numbers = #tpu.dot_dimension_numbers<[1], [0], [0], [1], [0, 0, 1, 1], [], []>} : vector<8x16xf32>, vector<16x128xf32>, vector<8x128xf32> -> vector<8x128xf32>
    %24 = arith.mulf %23, %7 : vector<8x128xf32>
    %c0_16 = arith.constant 0 : index
    %c0_17 = arith.constant 0 : index
    %25 = vector.load %arg7[%c0_16, %c0_17] : memref<128x16xf32, #tpu.memory_space<vmem>>, vector<128x16xf32>
    %cst_18 = arith.constant dense<0.000000e+00> : vector<8x16xf32>
    %26 = tpu.matmul %24, %25, %cst_18 {dimension_numbers = #tpu.dot_dimension_numbers<[1], [0], [0], [1], [0, 0, 1, 1], [], []>} : vector<8x128xf32>, vector<128x16xf32>, vector<8x16xf32> -> vector<8x16xf32>
    %c0_19 = arith.constant 0 : index
    %c0_20 = arith.constant 0 : index
    %27 = vector.load %arg8[%c0_19, %c0_20] : memref<1x16xf32, #tpu.memory_space<vmem>>, vector<1x16xf32>
    %28 = vector.broadcast %27 : vector<1x16xf32> to vector<8x16xf32>
    %29 = arith.addf %26, %28 : vector<8x16xf32>
    %c0_21 = arith.constant 0 : index
    %c0_22 = arith.constant 0 : index
    %30 = vector.load %arg9[%c0_21, %c0_22] : memref<8x16xf32, #tpu.memory_space<vmem>>, vector<8x16xf32>
    tpu.vector_store %arg9[%c0_21, %c0_22], %29 {strides = array<i32>} : memref<8x16xf32, #tpu.memory_space<vmem>>, vector<8x16xf32>,
    return
  }
  func.func @transform_0(%arg0: i32) -> (i32, i32) {
    %c0_i32 = arith.constant 0 : i32
    %c0_i32_0 = arith.constant 0 : i32
    return %arg0, %c0_i32 : i32, i32
  }
  func.func @transform_1(%arg0: i32) -> (i32, i32) {
    %c0_i32 = arith.constant 0 : i32
    %c0_i32_0 = arith.constant 0 : i32
    %c0_i32_1 = arith.constant 0 : i32
    return %c0_i32, %c0_i32_0 : i32, i32
  }
  func.func @transform_2(%arg0: i32) -> (i32, i32) {
    %c0_i32 = arith.constant 0 : i32
    %c0_i32_0 = arith.constant 0 : i32
    %c0_i32_1 = arith.constant 0 : i32
    return %c0_i32, %c0_i32_0 : i32, i32
  }
  func.func @transform_3(%arg0: i32) -> (i32, i32) {
    %c0_i32 = arith.constant 0 : i32
    %c0_i32_0 = arith.constant 0 : i32
    %c0_i32_1 = arith.constant 0 : i32
    return %c0_i32, %c0_i32_0 : i32, i32
  }
  func.func @transform_4(%arg0: i32) -> (i32, i32) {
    %c0_i32 = arith.constant 0 : i32
    %c0_i32_0 = arith.constant 0 : i32
    %c0_i32_1 = arith.constant 0 : i32
    return %c0_i32, %c0_i32_0 : i32, i32
  }
  func.func @transform_5(%arg0: i32) -> (i32, i32) {
    %c0_i32 = arith.constant 0 : i32
    %c0_i32_0 = arith.constant 0 : i32
    %c0_i32_1 = arith.constant 0 : i32
    return %c0_i32, %c0_i32_0 : i32, i32
  }
  func.func @transform_6(%arg0: i32) -> (i32, i32) {
    %c0_i32 = arith.constant 0 : i32
    %c0_i32_0 = arith.constant 0 : i32
    %c0_i32_1 = arith.constant 0 : i32
    return %c0_i32, %c0_i32_0 : i32, i32
  }
  func.func @transform_7(%arg0: i32) -> (i32, i32) {
    %c0_i32 = arith.constant 0 : i32
    %c0_i32_0 = arith.constant 0 : i32
    %c0_i32_1 = arith.constant 0 : i32
    return %c0_i32, %c0_i32_0 : i32, i32
  }
  func.func @transform_8(%arg0: i32) -> (i32, i32) {
    %c0_i32 = arith.constant 0 : i32
    %c0_i32_0 = arith.constant 0 : i32
    return %arg0, %c0_i32 : i32, i32
  }
}

</mosaic_0001>

<bundles_post_ra>
// kernel: tpu_custom_call.1
= control target key start
LH: loop header
LB: loop body
LE: loop exit
PB: predicated region body
PF: predicated region fallthrough
CT: control target
= control target key end

     0   :  { %13 = vsyncpa [#allocation3], 0  ;;  %s1388_s0 = inlined_call_operand.vmem [shape: f32[16,32], index: 0, kind: input, shape index: {}]   ;;  %s1389_s1 = inlined_call_operand.vmem [shape: f32[32,256], index: 1, kind: input, shape index: {}]   ;;  %s1390_s2 = inlined_call_operand.vmem [shape: f32[1,256], index: 2, kind: input, shape index: {}]   ;;  %s1391_s3 = inlined_call_operand.vmem [shape: f32[128,16], index: 3, kind: input, shape index: {}]   ;;  %s1392_s4 = inlined_call_operand.vmem [shape: f32[16,16], index: 4, kind: input, shape index: {}]   ;;  %s1393_s5 = inlined_call_operand.vmem [shape: f32[16,128], index: 5, kind: input, shape index: {}]   ;;  %s1394_s6 = inlined_call_operand.vmem [shape: f32[128,16], index: 6, kind: input, shape index: {}]   ;;  %s1395_s7 = inlined_call_operand.vmem [shape: f32[1,16], index: 7, kind: input, shape index: {}]   ;;  %s1396_s8 = inlined_call_operand.hbm [shape: f32[16,16], index: 8, kind: output, shape index: {}]  }
   0x1   :  { %15 = vsyncpa [#allocation3 + $0x1], 0  ;;  %s1104_s27 = smov 0   ;;  %s1106_s28 = smov 0  }
   0x2   :  { %s1108_s29 = smov 0   ;;  %s1110_s30 = smov 0  }
   0x3 LB: > { %s1125_s9 = sadd.s32 4294967295, %s1054_s30   ;;  %s811_s10 = sadd.s32 4294967294, %s1054_s30   ;;  %s1054_s30 = sphi %s1110_s30, %s1402_s30   ;;  %s1050_s29 = sphi %s1108_s29, %s1401_s29   ;;  %s1046_s28 = sphi %s1106_s28, %s1400_s28   ;;  %s1042_s27 = sphi %s1104_s27, %s1399_s27  }
   0x4   : > { %s1129_s11 = sadd.s32 1, %s1054_s30   ;;  %s201_s12 = sadd.s32 1, %s1050_s29 }
   0x5   : > { %s198_s13 = ssub.s32 %s1054_s30, %s1129_s11  ;;  %p211_p0 = scmp.ne.s32.totalorder %s1050_s29, %s1046_s28 }
   0x6   : > { %p199_p1 = scmp.eq.s32.totalorder %s198_s13, 0  ;;  %p212_p2 = scmp.eq.s32.totalorder %s1125_s9, 1 }
   0x7   : > { %p217_p3 = scmp.ne.s32.totalorder %s1046_s28, %s1042_s27  ;;  %p218_p4 = scmp.eq.s32.totalorder %s811_s10, 1 }
   0x8   : > { %s1140_s14 = scalar_select %p199_p1, %s1050_s29, %s201_s12  }
   0x9   : > { %p1142_p5 = por %p212_p2, %p211_p0  ;;  %p1146_p6 = por %p218_p4, %p217_p3 }
   0xa   : > { %p814_p7 = scmp.ge.s32.totalorder %s1054_s30, 1  ;;  %p264_p8 = scmp.lt.s32.totalorder %s1054_s30, 3 }
   0xc   : > { %p265_p9 = pnand %p814_p7, %p264_p8 }
   0xd   : > { %p297_p10 = scmp.lt.s32.totalorder (!%p265_p9), %s1125_s9, 1  ;;  %s294_s21 = sand.u32 (!%p265_p9), 1, %s1046_s28  }
   0xe   : > { %268 = sbr.rel (%p265_p9) target bundleno = 1191 (0x4a7), region = 52  ;;  %s815_s22 = sshll.u32 (!%p265_p9), %s294_s21, 3 }
   0xf   : > { %s822_s25 = sshll.u32 (!%p265_p9), %s1125_s9, 7  ;;  %s296_s26 = scalar_lea.vmem (!%p265_p9), [#allocation2], %s815_s22 }
  0x10   : > { %s1352_s17 = scalar_lea.hbm (!%p265_p9), %s1396_s8, %s822_s25  ;;  %s739_s18 = scalar_lea.sflag (!%p265_p9), [#allocation3], %s294_s21 }
  0x13   : > { %v309_v0 = vld [vmem:[%s1389_s1 + $0x38] sm:$0xff]  ;;  %v308_v1 = vld [vmem:[%s1389_s1 + $0x30] sm:$0xff]  ;;  %v307_v2 = vld [vmem:[%s1389_s1 + $0x28] sm:$0xff]  ;;  %v1056_v4 = vmov 0.0   ;;  %s298_s10 = scalar_select %p297_p10, %s1125_s9, 1  ;;  %vm322_vm0 = vcmask 261120   ;;  %v312_v26 = vlaneseq }
  0x14   : > { %350 = vmatprep.subr.mxu1 %v309_v0  ;;  %v306_v3 = vld [vmem:[%s1389_s1 + $0x20] sm:$0xff]  ;;  %390 = vmatprep.mubr.f32.mxu1 %v1056_v4  ;;  %v305_v5 = vld [vmem:[%s1389_s1 + $0x18] sm:$0xff]  ;;  %v304_v6 = vld [vmem:[%s1389_s1 + $0x10] sm:$0xff]  ;;  %vm1057_vm1 = vmmov 0   ;;  %vm484_vm2 = vcmask 130048   ;;  %s1058_s9 = smov [#allocation2]  }
  0x15   : > { %351 = vmatpush1.msra.mxu1 %v308_v1  ;;  %900 = vmatprep.subr.mxu0 %v1056_v4  ;;  %v303_v7 = vld [vmem:[%s1389_s1 + $0x8] sm:$0xff]  ;;  %s816_s19 = sshll.u32 %s298_s10, 3  ;;  %v302_v8 = vld [vmem:[%s1389_s1] sm:$0xff]  ;;  %v413_v10 = vld [vmem:[%s1391_s3 + $0x78] sm:$0xff]  ;;  %v313_v27 = vshrl.u32 %v312_v26, 7  ;;  %s752_s10 = sshll.u32 %s296_s26, 4  ;;  %s753_s10 = int_to_ptr.vmem [resolvable:$true] %s752_s10 }
  0x16   : > { %352 = vmatprep.subr.mxu1 %v307_v2  ;;  %s300_s24 = scalar_lea.vmem %s1388_s0, %s816_s19  ;;  %v412_v11 = vld [vmem:[%s1391_s3 + $0x70] sm:$0xff]  ;;  %v411_v12 = vld [vmem:[%s1391_s3 + $0x68] sm:$0xff]  ;;  %v410_v13 = vld [vmem:[%s1391_s3 + $0x60] sm:$0xff]  ;;  %904 = vmatprep.mubr.msk.f32.mxu0 %vm1057_vm1, %v1056_v4  ;;  %s994_s19 = scalar_lea.vmem %s753_s10, 128 }
  0x17   : > { %353 = vmatpush1.msra.mxu1 %v306_v3  ;;  %v301_v9 = vld [vmem:[%s300_s24] sm:$0xff]  ;;  %v409_v14 = vld [vmem:[%s1391_s3 + $0x58] sm:$0xff]  ;;  %v408_v15 = vld [vmem:[%s1391_s3 + $0x50] sm:$0xff]  ;;  %v314_v28 = vsub.s32 0, %v313_v27  ;;  %v318_v29 = vsub.s32 1, %v313_v27  ;;  %p995_p11 = scmp.ne.s32.totalorder %s753_s10, %s994_s19  ;;  %s998_s20 = sshll.u32 %s1058_s9, 4  ;;  %s999_s20 = int_to_ptr.vmem [resolvable:$false] %s998_s20 }
  0x18   : > { %354 = vmatprep.subr.mxu1 %v305_v5  ;;  %v407_v16 = vld [vmem:[%s1391_s3 + $0x48] sm:$0xff]  ;;  %v406_v17 = vld [vmem:[%s1391_s3 + $0x40] sm:$0xff]  ;;  %v405_v18 = vld [vmem:[%s1391_s3 + $0x38] sm:$0xff]  ;;  %s1000_s22 = scalar_lea.vmem %s999_s20, 256  ;;  %p1001_p0 = scmp.lt.s32.totalorder %s753_s10, %s999_s20 }
  0x19   : > { %355 = vmatpush1.msra.mxu1 %v304_v6  ;;  %v404_v19 = vld [vmem:[%s1391_s3 + $0x30] sm:$0xff]  ;;  %v403_v20 = vld [vmem:[%s1391_s3 + $0x28] sm:$0xff]  ;;  %v402_v21 = vld [vmem:[%s1391_s3 + $0x20] sm:$0xff]  ;;  %p996_p12 = pnand %p995_p11, %p1142_p5  ;;  %p1002_p1 = scmp.lt.s32.totalorder %s1000_s22, %s994_s19 }
  0x1a   : > { %356 = vmatprep.subr.mxu1 %v303_v7  ;;  %v401_v22 = vld [vmem:[%s1391_s3 + $0x18] sm:$0xff]  ;;  %v400_v23 = vld [vmem:[%s1391_s3 + $0x10] sm:$0xff]  ;;  %v399_v24 = vld [vmem:[%s1391_s3 + $0x8] sm:$0xff] }
  0x1b   : > { %357 = vmatpush1.msra.mxu1 %v302_v8  ;;  %v398_v25 = vld [vmem:[%s1391_s3] sm:$0xff]  ;;  %v492_v41 = vld [vmem:[%s1392_s4 + $0x8] sm:$0xff]  ;;  %v659_v54 = vld [vmem:[%s1394_s6 + $0x78] sm:$0xff]  ;;  %p997_p13 = pneg %p996_p12  ;;  %p1003_p2 = por %p1002_p1, %p1001_p0 }
  0x1c   : > { %817 = vmatmul.mubr.msk.f32.vlgmr.msra.gmra.mxu1 %vm322_vm0, %v301_v9  ;;  %865 = vmatprep.subr.mxu1 %v1056_v4  ;;  %v310_v30 = vld [vmem:[%s1390_s2] sm:$0x3]  ;;  %v569_v47 = vld [vmem:[%s1393_s5 + $0x8] sm:$0xff]  ;;  %v658_v55 = vld [vmem:[%s1394_s6 + $0x70] sm:$0xff] }
  0x1d   : > { %866 = vmatpush3.msra.mxu1 %v413_v10  ;;  %897 = vmatprep.mubr.msk.f32.mxu1 %vm1057_vm1, %v1056_v4  ;;  %v315_v31 = vrot.slane %v310_v30, %v314_v28  ;;  %v319_v32 = vrot.slane %v310_v30, %v318_v29  ;;  %v491_v42 = vld [vmem:[%s1392_s4] sm:$0xff]  ;;  %v657_v56 = vld [vmem:[%s1394_s6 + $0x68] sm:$0xff]  ;;  %v655_v58 = vld [vmem:[%s1394_s6 + $0x58] sm:$0xff]  ;;  %p1004_p3 = pnand %p1003_p2, %p997_p13 }
  0x1e   : > { %867 = vmatprep.subr.mxu1 %v1056_v4  ;;  %901 = vmatpush3.msra.mxu0 %v492_v41  ;;  %v568_v48 = vld [vmem:[%s1393_s5] sm:$0xff]  ;;  %v654_v59 = vld [vmem:[%s1394_s6 + $0x50] sm:$0xff]  ;;  %v653_v60 = vld [vmem:[%s1394_s6 + $0x48] sm:$0xff] }
  0x1f   : > { %868 = vmatpush3.msra.mxu1 %v412_v11  ;;  %902 = vmatprep.subr.mxu0 %v1056_v4  ;;  %v656_v57 = vld [vmem:[%s1394_s6 + $0x60] sm:$0xff]  ;;  %v651_v62 = vld [vmem:[%s1394_s6 + $0x38] sm:$0xff]  ;;  %v650_v63 = vld [vmem:[%s1394_s6 + $0x30] sm:$0xff] }
  0x20   : > { %869 = vmatprep.subr.mxu1 %v1056_v4  ;;  %903 = vmatpush3.msra.mxu0 %v491_v42  ;;  %v652_v61 = vld [vmem:[%s1394_s6 + $0x40] sm:$0xff]  ;;  %v649_v0 = vld [vmem:[%s1394_s6 + $0x28] sm:$0xff]  ;;  %v647_v2 = vld [vmem:[%s1394_s6 + $0x18] sm:$0xff] }
  0x21   : > { %870 = vmatpush3.msra.mxu1 %v411_v12  ;;  %907 = vmatprep.subr.mxu0 %v1056_v4  ;;  %v648_v1 = vld [vmem:[%s1394_s6 + $0x20] sm:$0xff]  ;;  %v646_v3 = vld [vmem:[%s1394_s6 + $0x10] sm:$0xff]  ;;  %v645_v5 = vld [vmem:[%s1394_s6 + $0x8] sm:$0xff] }
  0x22   : > { %871 = vmatprep.subr.mxu1 %v1056_v4  ;;  %v644_v6 = vld [vmem:[%s1394_s6] sm:$0xff] }
  0x23   : > { %872 = vmatpush3.msra.mxu1 %v410_v13  ;;  %v820_v10 = vld [vmem:[%s1395_s7] ss:$0 sm:$0xff] }
  0x24   : > { %873 = vmatprep.subr.mxu1 %v1056_v4 }
  0x25   : > { %874 = vmatpush3.msra.mxu1 %v409_v14 }
  0x26   : > { %875 = vmatprep.subr.mxu1 %v1056_v4 }
  0x27   : > { %876 = vmatpush3.msra.mxu1 %v408_v15 }
  0x28   : > { %877 = vmatprep.subr.mxu1 %v1056_v4 }
  0x29   : > { %878 = vmatpush3.msra.mxu1 %v407_v16 }
  0x2a   : > { %879 = vmatprep.subr.mxu1 %v1056_v4 }
  0x2b   : > { %880 = vmatpush3.msra.mxu1 %v406_v17 }
  0x2c   : > { %881 = vmatprep.subr.mxu1 %v1056_v4 }
  0x2d   : > { %882 = vmatpush3.msra.mxu1 %v405_v18 }
  0x2e   : > { %883 = vmatprep.subr.mxu1 %v1056_v4 }
  0x2f   : > { %884 = vmatpush3.msra.mxu1 %v404_v19 }
  0x30   : > { %885 = vmatprep.subr.mxu1 %v1056_v4 }
  0x31   : > { %886 = vmatpush3.msra.mxu1 %v403_v20 }
  0x32   : > { %887 = vmatprep.subr.mxu1 %v1056_v4 }
  0x33   : > { %888 = vmatpush3.msra.mxu1 %v402_v21 }
  0x34   : > { %889 = vmatprep.subr.mxu1 %v1056_v4 }
  0x35   : > { %890 = vmatpush3.msra.mxu1 %v401_v22 }
  0x36   : > { %891 = vmatprep.subr.mxu1 %v1056_v4 }
  0x37   : > { %892 = vmatpush3.msra.mxu1 %v400_v23 }
  0x38   : > { %893 = vmatprep.subr.mxu1 %v1056_v4 }
  0x39   : > { %894 = vmatpush3.msra.mxu1 %v399_v24 }
  0x3a   : > { %895 = vmatprep.subr.mxu1 %v1056_v4 }
  0x3b   : > { %896 = vmatpush3.msra.mxu1 %v398_v25 }
  0xdc   : > { %v392_v33 = vpop.f32.mrf.mxu1 }
  0xdd   : > { %v393_v35 = vadd.f32 %v392_v33, %v315_v31 }
  0xde   : > { %v394_v34 = vpop.f32.mrf.mxu1 }
  0xdf   : > { %v1254_v36 = vadd.f32 %v394_v34, %v319_v32 }
  0xe1   : > { %v397_v37 = vmul.f32 %v1254_v36, %v393_v35 }
  0xe3   : > { %898 = vmatmul.mubr.f32.vlgmr.msra.gmra.mxu1 %v397_v37 }
 0x1a3   : > { %v480_v38 = vpop.f32.mrf.mxu1 }
 0x1a4   : > { %v485_v39 = vsel %vm484_vm2, %v480_v38, -inf }
 0x1a5   : > { %v899_v40 = vpop.f32.mrf.mxu1  ;;  %486 = vmax.xlane.f32.xlu0 %v485_v39 }
 0x22e   : > { %v487_v43 = vpop.xlane.xlu0 %486 }
 0x22f   : > { %v488_v44 = vsub.f32 %v480_v38, %v487_v43 }
 0x231   : > { %v489_v45 = vmul.f32 1.442695, %v488_v44 }
 0x233   : > { %990 = vpow2.f32 %v489_v45 }
 0x240   : > { %v991_v46 = vpop.eup %990 }
 0x241   : > { %905 = vmatmul.mubr.msk.f32.vlgmr.msra.gmra.mxu0 %vm484_vm2, %v991_v46 }
 0x242   : > { %911 = vmatprep.mubr.msk.f32.mxu0 %vm1057_vm1, %v1056_v4  ;;  %908 = vmatpush3.msra.mxu0 %v569_v47 }
 0x243   : > { %909 = vmatprep.subr.mxu0 %v1056_v4 }
 0x244   : > { %910 = vmatpush3.msra.mxu0 %v568_v48 }
 0x245   : > { %914 = vmatprep.subr.mxu0 %v1056_v4 }
 0x301   : > { %v562_v49 = vpop.f32.mrf.mxu0 }
 0x302   : > { %v563_v50 = vadd.f32 1e-30, %v562_v49 }
 0x303   : > { %v906_v51 = vpop.f32.mrf.mxu0 }
 0x304   : > { %992 = vrcp.f32 %v563_v50 }
 0x311   : > { %v993_v52 = vpop.eup %992 }
 0x312   : > { %v567_v53 = vmul.f32 %v993_v52, %v991_v46 }
 0x314   : > { %912 = vmatmul.mubr.msk.f32.vlgmr.msra.gmra.mxu0 %vm484_vm2, %v567_v53 }
 0x315   : > { %915 = vmatpush3.msra.mxu0 %v659_v54  ;;  %946 = vmatprep.mubr.msk.f32.mxu0 %vm1057_vm1, %v1056_v4 }
 0x316   : > { %916 = vmatprep.subr.mxu0 %v1056_v4 }
 0x317   : > { %917 = vmatpush3.msra.mxu0 %v658_v55 }
 0x318   : > { %918 = vmatprep.subr.mxu0 %v1056_v4 }
 0x319   : > { %919 = vmatpush3.msra.mxu0 %v657_v56 }
 0x31a   : > { %920 = vmatprep.subr.mxu0 %v1056_v4 }
 0x31b   : > { %921 = vmatpush3.msra.mxu0 %v656_v57 }
 0x31c   : > { %922 = vmatprep.subr.mxu0 %v1056_v4 }
 0x31d   : > { %923 = vmatpush3.msra.mxu0 %v655_v58 }
 0x31e   : > { %924 = vmatprep.subr.mxu0 %v1056_v4 }
 0x31f   : > { %925 = vmatpush3.msra.mxu0 %v654_v59 }
 0x320   : > { %926 = vmatprep.subr.mxu0 %v1056_v4 }
 0x321   : > { %927 = vmatpush3.msra.mxu0 %v653_v60 }
 0x322   : > { %928 = vmatprep.subr.mxu0 %v1056_v4 }
 0x323   : > { %929 = vmatpush3.msra.mxu0 %v652_v61 }
 0x324   : > { %930 = vmatprep.subr.mxu0 %v1056_v4 }
 0x325   : > { %931 = vmatpush3.msra.mxu0 %v651_v62 }
 0x326   : > { %932 = vmatprep.subr.mxu0 %v1056_v4 }
 0x327   : > { %933 = vmatpush3.msra.mxu0 %v650_v63 }
 0x328   : > { %934 = vmatprep.subr.mxu0 %v1056_v4 }
 0x329   : > { %935 = vmatpush3.msra.mxu0 %v649_v0 }
 0x32a   : > { %936 = vmatprep.subr.mxu0 %v1056_v4 }
 0x32b   : > { %937 = vmatpush3.msra.mxu0 %v648_v1 }
 0x32c   : > { %938 = vmatprep.subr.mxu0 %v1056_v4 }
 0x32d   : > { %939 = vmatpush3.msra.mxu0 %v647_v2 }
 0x32e   : > { %940 = vmatprep.subr.mxu0 %v1056_v4 }
 0x32f   : > { %941 = vmatpush3.msra.mxu0 %v646_v3 }
 0x330   : > { %942 = vmatprep.subr.mxu0 %v1056_v4 }
 0x331   : > { %943 = vmatpush3.msra.mxu0 %v645_v5 }
 0x332   : > { %944 = vmatprep.subr.mxu0 %v1056_v4 }
 0x333   : > { %945 = vmatpush3.msra.mxu0 %v644_v6 }
 0x3d4   : > { %v639_v7 = vpop.f32.mrf.mxu0 }
 0x3d5   : > { %v643_v8 = vmul.f32 %v639_v7, %v1254_v36 }
 0x3d6   : > { %v913_v9 = vpop.f32.mrf.mxu0 }
 0x3d7   : > { %947 = vmatmul.mubr.f32.vlgmr.msra.gmra.mxu0 %v643_v8 }
 0x497   : > { %v733_v4 = vpop.f32.mrf.mxu0 }
 0x498   : > { %v734_v11 = vadd.f32 %v820_v10, %v733_v4 }
 0x499   : > { %v948_v12 = vpop.f32.mrf.mxu0 }
 0x49a   : > { %737 = vst.msk [vmem:[%s296_s26] sm:$0xff] %vm484_vm2, %v734_v11 }
 0x49b   : > { %1007 = shalt.err (!%p1004_p3)
}
 0x49c   : > { %s1008_s23 = scalar_lea.hbm %s1352_s17, 128  ;;  %s1012_s25 = scalar_lea.hbm %s1396_s8, 256 }
 0x49d   : > { %p1009_p4 = scmp.ne.s32.totalorder %s1352_s17, %s1008_s23  ;;  %p1013_p9 = scmp.lt.s32.totalorder %s1352_s17, %s1396_s8 }
 0x49e   : > { %p1014_p10 = scmp.lt.s32.totalorder %s1012_s25, %s1008_s23 }
 0x49f   : > { %p1010_p7 = pnand %p1009_p4, %p1142_p5 }
 0x4a0   : > { %p1015_p11 = por %p1014_p10, %p1013_p9 }
 0x4a1   : > { %p1011_p8 = pneg %p1010_p7 }
 0x4a3   : > { %p1016_p12 = pnand %p1015_p11, %p1011_p8 }
 0x4a5   : > { %1019 = shalt.err (!%p1016_p12)
}
 0x4a6   : > { %949 = dma.vmem_to_hbm [thread:$0]  (%p1142_p5), %s753_s10, 128, %s1352_s17, %s739_s18  }
 0x4a7 PF: > { %p955_p13 = scmp.ge.s32.totalorder %s1054_s30, 2  ;;  %s764_s13 = sand.u32 1, %s1042_s27  }
 0x4a8   : > { %s765_s19 = scalar_lea.sflag [#allocation3], %s764_s13 }
 0x4a9   : > { %p952_p0 = pnand %p955_p13, %p1146_p6 }
 0x4ab   : > { %p953_p1 = pneg %p952_p0 }
 0x4ad   : > { %1037 = dma.done.wait (%p953_p1), %s765_s19, 128  }
 0x4ae   : > { %1039 = vsyncadd (%p953_p1), %s765_s19, 4294967168  ;;  %p18_p2 = scmp.ge.s32.totalorder %s1129_s11, 4   ;;  %s1399_s27 = smov %s1046_s28 }
 0x4af   : > { %s1400_s28 = smov %s1050_s29  ;;  %s1401_s29 = smov %s1140_s14 }
 0x4b0   : > { %s1402_s30 = smov %s1129_s11  ;;  %20 = sbr.rel (!%p18_p2) target bundleno = 3 (0x3), region = 87 }
 0x4b5   :  { %770 = vsyncpa [#allocation3], 1 }
 0x4b6   :  { %772 = vsyncpa [#allocation3 + $0x1], 1 }

</bundles_post_ra>
